<compile_context>
chip_gen: v7x
topology: tpu7x:2x2x1
jax: 0.10.0
libtpu: 0.0.40
codegen_flags: <defaults>
</compile_context>

<pallas_src>
import math
import jax
import jax.numpy as jnp
from jax.experimental import pallas as pl
from jax.experimental.pallas import tpu as pltpu


# ------------------------------ kernels ----------------------------------- #
# Variant A: full reduction dim in one block, 2-D grid (j over N, i over M).

def _proj_a_bias(x_ref, w_ref, b_ref, o_ref):
    acc = jnp.dot(x_ref[...], w_ref[...], preferred_element_type=jnp.float32)
    o_ref[...] = (acc + b_ref[...]).astype(o_ref.dtype)


def _proj_a_nobias(x_ref, w_ref, o_ref):
    acc = jnp.dot(x_ref[...], w_ref[...], preferred_element_type=jnp.float32)
    o_ref[...] = acc.astype(o_ref.dtype)


# Variant B: tiled reduction (K last grid axis, f32 VMEM accumulator).

def _proj_b_bias(x_ref, w_ref, b_ref, o_ref, acc_ref):
    @pl.when(pl.program_id(2) == 0)
    def _():
        acc_ref[...] = jnp.zeros_like(acc_ref)

    acc_ref[...] += jnp.dot(x_ref[...], w_ref[...],
                            preferred_element_type=jnp.float32)

    @pl.when(pl.program_id(2) == pl.num_programs(2) - 1)
    def _():
        o_ref[...] = (acc_ref[...] + b_ref[...]).astype(o_ref.dtype)


def _proj_b_nobias(x_ref, w_ref, o_ref, acc_ref):
    @pl.when(pl.program_id(2) == 0)
    def _():
        acc_ref[...] = jnp.zeros_like(acc_ref)

    acc_ref[...] += jnp.dot(x_ref[...], w_ref[...],
                            preferred_element_type=jnp.float32)

    @pl.when(pl.program_id(2) == pl.num_programs(2) - 1)
    def _():
        o_ref[...] = acc_ref[...].astype(o_ref.dtype)


# ------------------------------ helpers ------------------------------------ #

def _round_up(x, mult):
    return ((x + mult - 1) // mult) * mult


def _pick_tile(dim, preferred, aligns=(256, 128)):
    """Largest `align`-aligned divisor of `dim` that is <= preferred.
    Falls back to the full dimension (always a legal block shape)."""
    if dim <= preferred:
        return dim
    for align in aligns:
        if dim % align != 0:
            continue
        t = (min(preferred, dim) // align) * align
        while t >= align:
            if dim % t == 0:
                return t
            t -= align
    return dim


def _vmem_budget():
    """Generation-aware VMEM budget for tiles + compiler scratch."""
    cap = None
    try:
        cap = getattr(pltpu.get_tpu_info(), "vmem_capacity_bytes", None)
    except Exception:
        cap = None
    if cap is None:
        cap = 64 << 20                      # conservative (v7x-sized VMEM)
    if cap >= (100 << 20):                  # v5e / v6e: 128 MiB physical
        return 96 << 20
    return min(int(cap * 0.62), 40 << 20)   # v7x (64 MiB/TC) or unknown


# ------------------------------ wrapper ------------------------------------ #

def prepare_for_mha(x, weight_t, bias, heads, d_k, *,
                    tm=None, tn=None, tk=None, compute_dtype=None):
    """Pallas equivalent of PrepareForMultiHeadAttention.forward.

    x        : (..., d_model)
    weight_t : (d_model, heads*d_k)  -- pre-transposed nn.Linear weight
    bias     : (heads*d_k,) or None
    returns  : (..., heads, d_k)
    """
    head_shape = x.shape[:-1]
    d_model = x.shape[-1]
    n_out = heads * d_k
    assert weight_t.shape == (d_model, n_out), weight_t.shape

    m = math.prod(head_shape) if head_shape else 1
    x2d = x.reshape(m, d_model)
    out_dtype = x.dtype

    # Optional low-precision MXU operands (f32 accumulation is kept either way).
    if compute_dtype is not None:
        x2d = x2d.astype(compute_dtype)
        weight_t = weight_t.astype(compute_dtype)

    itm = max(jnp.dtype(x2d.dtype).itemsize, jnp.dtype(weight_t.dtype).itemsize)
    itm_x = jnp.dtype(x2d.dtype).itemsize
    itm_w = jnp.dtype(weight_t.dtype).itemsize
    itm_o = jnp.dtype(out_dtype).itemsize

    # ---- lane-dense N: pad heads*d_k up to a multiple of 128 -----------------
    n_pad = _round_up(n_out, 128)
    if n_pad != n_out:
        weight_t = jnp.pad(weight_t, ((0, 0), (0, n_pad - n_out)))
    has_bias = bias is not None
    if has_bias:
        b = bias.astype(jnp.float32)
        if n_pad != n_out:
            b = jnp.pad(b, (0, n_pad - n_out))
        b2d = b.reshape(1, n_pad)

    budget = _vmem_budget()

    # ---- tile selection -------------------------------------------------------
    if tn is None:
        tn = _pick_tile(n_pad, 512)
    tn = min(tn, n_pad)
    if tn < n_pad and tn % 128 != 0:
        tn = max(128, (tn // 128) * 128)
        tn = min(tn, n_pad)

    def _fits_a(tm_):
        return 2 * itm * (tm_ * d_model + d_model * tn + tm_ * tn) <= budget

    if tk is None:
        # Prefer a single K block: each weight stripe is read from HBM exactly
        # once per call and there is no accumulator read-modify-write.
        tk = d_model if _fits_a(min(256, m)) else _pick_tile(d_model, 1024)
    tk = min(tk, d_model)
    if d_model % tk != 0:                 # keep the reduction exact (no OOB K)
        tk = _pick_tile(d_model, tk)
    use_a = (tk == d_model)

    if tm is None:
        tm = min(8, m)
        for cand in (1024, 512, 256, 128, 64, 32, 16, 8):
            tm_c = min(cand, m)
            if use_a:
                need = 2 * itm * (tm_c * d_model + d_model * tn + tm_c * tn)
            else:
                need = (2 * itm * (tm_c * tk + tk * tn + tm_c * tn)
                        + 4 * tm_c * tn)
            if need <= budget:
                tm = tm_c
                break
    tm = min(tm, m)
    if tm < m and tm % 8 != 0:
        tm = max(8, (tm // 8) * 8)
        tm = min(tm, m)

    # ---- grid & specs ---------------------------------------------------------
    # Outer axis = N tiles, inner axis = M tiles, so the weight / bias block
    # index only changes on the slow axis (read once per stripe); the M grid
    # uses cdiv so a partial trailing row block needs no host-side padding.
    if use_a:
        grid = (pl.cdiv(n_pad, tn), pl.cdiv(m, tm))
        x_spec = pl.BlockSpec((tm, d_model), lambda j, i: (i, 0))
        w_spec = pl.BlockSpec((d_model, tn), lambda j, i: (0, j))
        o_spec = pl.BlockSpec((tm, tn), lambda j, i: (i, j))
        b_spec = pl.BlockSpec((1, tn), lambda j, i: (0, j))
        scratch = []
        kernel = _proj_a_bias if has_bias else _proj_a_nobias
        dims = ("parallel", "parallel")
    else:
        grid = (pl.cdiv(n_pad, tn), pl.cdiv(m, tm), d_model // tk)
        x_spec = pl.BlockSpec((tm, tk), lambda j, i, k: (i, k))
        w_spec = pl.BlockSpec((tk, tn), lambda j, i, k: (k, j))
        o_spec = pl.BlockSpec((tm, tn), lambda j, i, k: (i, j))
        b_spec = pl.BlockSpec((1, tn), lambda j, i, k: (0, j))
        scratch = [pltpu.VMEM((tm, tn), jnp.float32)]
        kernel = _proj_b_bias if has_bias else _proj_b_nobias
        dims = ("parallel", "parallel", "arbitrary")

    in_specs = [x_spec, w_spec] + ([b_spec] if has_bias else [])
    operands = (x2d, weight_t) + ((b2d,) if has_bias else ())

    # Advisory cost estimate (real, un-padded problem size).
    cost = pl.CostEstimate(
        flops=2 * m * d_model * n_out,
        transcendentals=0,
        bytes_accessed=(m * d_model * itm_x
                        + d_model * n_out * itm_w
                        + (n_out * 4 if has_bias else 0)
                        + m * n_out * itm_o),
    )

    out2d = pl.pallas_call(
        kernel,
        out_shape=jax.ShapeDtypeStruct((m, n_pad), out_dtype),
        grid_spec=pltpu.PrefetchScalarGridSpec(
            num_scalar_prefetch=0,
            grid=grid,
            in_specs=in_specs,
            out_specs=o_spec,
            scratch_shapes=scratch,
        ),
        compiler_params=pltpu.CompilerParams(
            dimension_semantics=dims,
            vmem_limit_bytes=budget,
        ),
        cost_estimate=cost,
    )(*operands)

    if n_pad != n_out:
        out2d = out2d[:, :n_out]
    return out2d.reshape(*head_shape, heads, d_k)


# ------------------------------ reference ---------------------------------- #

def _reference(x, weight_t, bias, heads, d_k):
    y = jnp.einsum("...d,do->...o", x, weight_t)
    if bias is not None:
        y = y + bias
    return y.reshape(*x.shape[:-1], heads, d_k)


# -------------------------------- main -------------------------------------- #

if __name__ == "__main__":
    key = jax.random.PRNGKey(0)
    k1, k2, k3, k4, k5 = jax.random.split(key, 5)

    # ---- test 1: module-sized shapes (seq=8, batch=2, d_model=32, 4 heads x 16)
    # Exercises variant A (single K block), N padding 64 -> 128, bias path.
    seq_len, batch, d_model = 8, 2, 32
    heads, d_k = 4, 16

    x = jax.random.normal(k1, (seq_len, batch, d_model), dtype=jnp.float32)
    bound = 1.0 / math.sqrt(d_model)
    weight = jax.random.uniform(k2, (heads * d_k, d_model),
                                minval=-bound, maxval=bound, dtype=jnp.float32)
    bias = jax.random.uniform(k3, (heads * d_k,),
                              minval=-bound, maxval=bound, dtype=jnp.float32)
    # Parameter stored pre-transposed as (d_model, heads*d_k); transpose ONCE here.
    weight_t = weight.T

    out = jax.block_until_ready(prepare_for_mha(x, weight_t, bias, heads, d_k))
    ref = _reference(x, weight_t, bias, heads, d_k)
    assert out.shape == (seq_len, batch, heads, d_k), out.shape
    assert jnp.allclose(out, ref, atol=1e-4, rtol=1e-4), \
        float(jnp.max(jnp.abs(out - ref)))

    # ---- test 2: multi-tile grid, partial trailing M block (m=40, tm=16),
    # K accumulator path (variant B, 2 K steps), no bias.
    seq2, batch2, d_model2 = 5, 8, 256
    heads2, d_k2 = 2, 64
    x2 = jax.random.normal(k4, (seq2, batch2, d_model2), dtype=jnp.float32)
    bound2 = 1.0 / math.sqrt(d_model2)
    weight2_t = jax.random.uniform(k5, (d_model2, heads2 * d_k2),
                                   minval=-bound2, maxval=bound2,
                                   dtype=jnp.float32)

    out2 = jax.block_until_ready(
        prepare_for_mha(x2, weight2_t, None, heads2, d_k2, tm=16, tn=128, tk=128))
    ref2 = _reference(x2, weight2_t, None, heads2, d_k2)
    assert out2.shape == (seq2, batch2, heads2, d_k2), out2.shape
    assert jnp.allclose(out2, ref2, atol=1e-4, rtol=1e-4), \
        float(jnp.max(jnp.abs(out2 - ref2)))

    print("KERNEL_OK")
</pallas_src>

<mosaic_0001>
module attributes {stable_mosaic.version = 11 : i64} {
  func.func @_proj_a_bias(%arg0: i32, %arg1: i32, %arg2: memref<16x32xf32, #tpu.memory_space<vmem>>, %arg3: memref<32x128xf32, #tpu.memory_space<vmem>>, %arg4: memref<1x128xf32, #tpu.memory_space<vmem>>, %arg5: memref<16x128xf32, #tpu.memory_space<vmem>>) attributes {dimension_semantics = [#tpu.dimension_semantics<parallel>, #tpu.dimension_semantics<parallel>], iteration_bounds = array<i64: 1, 1>, scalar_prefetch = 0 : i64, scratch_operands = 0 : i64, tpu.core_type = #tpu.core_type<tc>, window_params = [{transform_indices = @transform_0, window_bounds = array<i64: 16, 32>}, {transform_indices = @transform_1, window_bounds = array<i64: 32, 128>}, {transform_indices = @transform_2, window_bounds = array<i64: 1, 128>}, {transform_indices = @transform_3, window_bounds = array<i64: 16, 128>}]} {
    %c0 = arith.constant 0 : index
    %c0_0 = arith.constant 0 : index
    %0 = vector.load %arg2[%c0, %c0_0] : memref<16x32xf32, #tpu.memory_space<vmem>>, vector<16x32xf32>
    %c0_1 = arith.constant 0 : index
    %c0_2 = arith.constant 0 : index
    %1 = vector.load %arg3[%c0_1, %c0_2] : memref<32x128xf32, #tpu.memory_space<vmem>>, vector<32x128xf32>
    %cst = arith.constant dense<0.000000e+00> : vector<16x128xf32>
    %2 = tpu.matmul %0, %1, %cst {dimension_numbers = #tpu.dot_dimension_numbers<[1], [0], [0], [1], [0, 0, 1, 1], [], []>} : vector<16x32xf32>, vector<32x128xf32>, vector<16x128xf32> -> vector<16x128xf32>
    %c0_3 = arith.constant 0 : index
    %c0_4 = arith.constant 0 : index
    %3 = vector.load %arg4[%c0_3, %c0_4] : memref<1x128xf32, #tpu.memory_space<vmem>>, vector<1x128xf32>
    %4 = vector.broadcast %3 : vector<1x128xf32> to vector<16x128xf32>
    %5 = arith.addf %2, %4 : vector<16x128xf32>
    %c0_5 = arith.constant 0 : index
    %c0_6 = arith.constant 0 : index
    %6 = vector.load %arg5[%c0_5, %c0_6] : memref<16x128xf32, #tpu.memory_space<vmem>>, vector<16x128xf32>
    tpu.vector_store %arg5[%c0_5, %c0_6], %5 {strides = array<i32>} : memref<16x128xf32, #tpu.memory_space<vmem>>, vector<16x128xf32>,
    return
  }
  func.func @transform_0(%arg0: i32, %arg1: i32) -> (i32, i32) {
    %c0_i32 = arith.constant 0 : i32
    %c0_i32_0 = arith.constant 0 : i32
    return %arg1, %c0_i32 : i32, i32
  }
  func.func @transform_1(%arg0: i32, %arg1: i32) -> (i32, i32) {
    %c0_i32 = arith.constant 0 : i32
    %c0_i32_0 = arith.constant 0 : i32
    return %c0_i32, %arg0 : i32, i32
  }
  func.func @transform_2(%arg0: i32, %arg1: i32) -> (i32, i32) {
    %c0_i32 = arith.constant 0 : i32
    %c0_i32_0 = arith.constant 0 : i32
    return %c0_i32, %arg0 : i32, i32
  }
  func.func @transform_3(%arg0: i32, %arg1: i32) -> (i32, i32) {
    %c0_i32 = arith.constant 0 : i32
    return %arg1, %arg0 : i32, i32
  }
}

</mosaic_0001>

<bundles_post_ra>
// kernel: tpu_custom_call.1
= control target key start
LH: loop header
LB: loop body
LE: loop exit
PB: predicated region body
PF: predicated region fallthrough
CT: control target
= control target key end

     0   :  { %8 = vsyncpa [#allocation3], 0  ;;  %s336_s0 = inlined_call_operand.hbm [shape: f32[16,32], index: 0, kind: input, shape index: {}]   ;;  %s337_s1 = inlined_call_operand.hbm [shape: f32[32,128], index: 1, kind: input, shape index: {}]   ;;  %s338_s2 = inlined_call_operand.vmem [shape: f32[1,128], index: 2, kind: input, shape index: {}]   ;;  %s339_s3 = inlined_call_operand.hbm [shape: f32[16,128], index: 3, kind: output, shape index: {}]  }
   0x1   :  { %9 = vsyncpa [#allocation6], 0 }
   0x2   :  { %10 = vsyncpa [#allocation4], 0  ;;  %s263_s12 = smov [#allocation2]   ;;  %s191_s16 = scalar_lea.hbm %s336_s0, 256 }
   0x3   :  { %s16_s13 = sshll.u32 %s263_s12, 4  ;;  %p192_p0 = scmp.ne.s32.totalorder %s336_s0, %s191_s16  ;;  %s17_s13 = int_to_ptr.vmem [resolvable:$true] %s16_s13 }
   0x4   :  { %p195_p1 = scmp.lt.u32.totalorder %s191_s16, %s336_s0 }
   0x6   :  { %p197_p2 = pnand %p195_p1, %p192_p0 }
   0x8   :  { %200 = shalt.err (!%p197_p2)
}
   0x9   :  { %s201_s21 = scalar_lea.vmem %s17_s13, 256  ;;  %p206_p4 = scmp.lt.s32.totalorder %s17_s13, %s17_s13 }
   0xa   :  { %p202_p3 = scmp.ne.s32.totalorder %s17_s13, %s201_s21  ;;  %p207_p5 = scmp.lt.s32.totalorder %s201_s21, %s201_s21 }
   0xc   :  { %p208_p6 = por %p207_p5, %p206_p4 }
   0xe   :  { %p209_p7 = pnand %p208_p6, %p202_p3 }
  0x10   :  { %212 = shalt.err (!%p209_p7)
}
  0x11   :  { %s264_s22 = smov 128   ;;  %s265_s23 = smov 8  }
  0x12   :  { %22 = dma.hbm_to_vmem [thread:$0]  %s336_s0, 256, %s17_s13, [#allocation3], %s264_s22, %s264_s22, %s265_s23  }
  0x13   :  { %s266_s26 = smov [#allocation5]   ;;  %s213_s30 = scalar_lea.hbm %s337_s1, 512 }
  0x14   :  { %s28_s27 = sshll.u32 %s266_s26, 4  ;;  %p214_p8 = scmp.ne.s32.totalorder %s337_s1, %s213_s30  ;;  %s29_s27 = int_to_ptr.vmem [resolvable:$true] %s28_s27 }
  0x15   :  { %p217_p9 = scmp.lt.u32.totalorder %s213_s30, %s337_s1 }
  0x17   :  { %p219_p10 = pnand %p217_p9, %p214_p8 }
  0x19   :  { %222 = shalt.err (!%p219_p10)
}
  0x1a   :  { %s223_s8 = scalar_lea.vmem %s29_s27, 512  ;;  %p228_p12 = scmp.lt.s32.totalorder %s29_s27, %s29_s27 }
  0x1b   :  { %p224_p11 = scmp.ne.s32.totalorder %s29_s27, %s223_s8  ;;  %p229_p13 = scmp.lt.s32.totalorder %s223_s8, %s223_s8 }
  0x1d   :  { %p230_p0 = por %p229_p13, %p228_p12 }
  0x1f   :  { %p231_p1 = pnand %p230_p0, %p224_p11 }
  0x21   :  { %234 = shalt.err (!%p231_p1)
}
  0x22   :  { %34 = dma.hbm_to_vmem [thread:$0]  %s337_s1, 512, %s29_s27, [#allocation6], %s264_s22, %s264_s22, %s265_s23  }
  0x23   :  { %257 = dma.done.wait [#allocation3], 256  }
  0x24   :  { %258 = vsyncadd [#allocation3], 4294967040 }
  0x25   :  { %259 = dma.done.wait [#allocation6], 512  }
  0x26   :  { %260 = vsyncadd [#allocation6], 4294966784  ;;  %vm56_vm0 = vcmask 261120   ;;  %v45_v0 = vld [vmem:[#allocation5] sm:$0xff]  ;;  %v46_v1 = vld [vmem:[#allocation5 + $0x8] sm:$0xff]  ;;  %s267_s11 = smov [#allocation7]  }
  0x27   :  { %v47_v2 = vld [vmem:[#allocation5 + $0x10] sm:$0xff]  ;;  %v178_v3 = vpack.c.bf16 %v46_v1, %v45_v0  ;;  %v48_v4 = vld [vmem:[#allocation5 + $0x18] sm:$0xff]  ;;  %s145_s12 = sshll.u32 %s267_s11, 4  ;;  %s146_s12 = int_to_ptr.vmem [resolvable:$true] %s145_s12 }
  0x28   :  { %v43_v5 = vld [vmem:[#allocation2] sm:$0xff]  ;;  %v182_v6 = vpack.c.bf16 %v48_v4, %v47_v2  ;;  %v44_v7 = vld [vmem:[#allocation2 + $0x8] sm:$0xff]  ;;  %s235_s13 = scalar_lea.vmem %s146_s12, 256  ;;  %p240_p3 = scmp.lt.s32.totalorder %s146_s12, %s146_s12 }
  0x29   :  { %175 = vmatprep.mubr.msk.f32.mxu0 %vm56_vm0, %v43_v5  ;;  %179 = vmatprep.subr.bf16.mxu0 %v178_v3  ;;  %v158_v8 = vld [vmem:[%s338_s2] ss:$0 sm:$0xff]  ;;  %p236_p2 = scmp.ne.s32.totalorder %s146_s12, %s235_s13  ;;  %p241_p4 = scmp.lt.s32.totalorder %s235_s13, %s235_s13 }
  0x2a   :  { %181 = vmatpush3.bf16.msra.mxu0 %v178_v3 }
  0x2b   :  { %183 = vmatprep.subr.bf16.mxu0 %v182_v6  ;;  %p242_p5 = por %p241_p4, %p240_p3 }
  0x2d   :  { %p243_p6 = pnand %p242_p5, %p236_p2 }
  0x2e   :  { %185 = vmatpush3.bf16.msra.mxu0 %v182_v6 }
  0x31   :  { %176 = vmatmul.mubr.msk.f32.vlgmr.msra.gmra.mrb[0].mxu0 %vm56_vm0, %v44_v7 }
 0x104   :  { %v177_v9 = vpop.f32.mrb[0].mxu0 }
 0x105   :  { %v135_v10 = vadd.f32 %v177_v9, %v158_v8  ;;  %v129_v11 = vpop.f32.mrb[1].mxu0 }
 0x106   :  { %v130_v12 = vadd.f32 %v158_v8, %v129_v11 }
 0x107   :  { %139 = vst [vmem:[#allocation7 + $0x8] sm:$0xff] %v135_v10 }
 0x108   :  { %138 = vst [vmem:[#allocation7] sm:$0xff] %v130_v12 }
 0x109   :  { %246 = shalt.err (!%p243_p6)
}
 0x10a   :  { %s247_s2 = scalar_lea.hbm %s339_s3, 256 }
 0x10b   :  { %p248_p7 = scmp.ne.s32.totalorder %s339_s3, %s247_s2  ;;  %p251_p8 = scmp.lt.u32.totalorder %s247_s2, %s339_s3 }
 0x10d   :  { %p253_p9 = pnand %p251_p8, %p248_p7 }
 0x10f   :  { %256 = shalt.err (!%p253_p9)
}
 0x110   :  { %151 = dma.vmem_to_hbm [thread:$0]  %s146_s12, 256, %s339_s3, [#allocation4], %s264_s22, %s264_s22, %s265_s23  }
 0x111   :  { %261 = dma.done.wait [#allocation4], 256  }
 0x112   :  { %262 = vsyncadd [#allocation4], 4294967040 }
 0x113   :  { %155 = vsyncpa [#allocation3], 1 }
 0x114   :  { %156 = vsyncpa [#allocation6], 1 }
 0x115   :  { %157 = vsyncpa [#allocation4], 1 }

</bundles_post_ra>
